<compile_context>
chip_gen: v5e
topology: v5e:2x2
jax: 0.10.0
libtpu: 0.0.40
codegen_flags: <defaults>
</compile_context>

<pallas_src>
import math
import functools

import jax
import jax.numpy as jnp
from jax import lax
from jax.experimental import pallas as pl
from jax.experimental.pallas import tpu as pltpu


# ------------------------------ tiling helper -------------------------------

def _pick_tile(dim, target, multiple):
    """Largest t <= target with t % multiple == 0 and dim % t == 0.

    Falls back to the full dim (a full-extent block is always legal for the
    (8, 128) BlockSpec constraint) instead of returning odd divisors.
    """
    if dim <= target:
        return dim
    t = (target // multiple) * multiple
    while t >= multiple:
        if dim % t == 0:
            return t
        t -= multiple
    # TODO(synk): pad + mask instead of taking a full-extent block for huge
    # unaligned dims.
    return dim


# --------------------------- tiled linear (GEMM) ----------------------------

def _matmul_kernel(x_ref, w_ref, o_ref, acc_ref):
    @pl.when(pl.program_id(2) == 0)
    def _():
        acc_ref[...] = jnp.zeros_like(acc_ref)

    acc_ref[...] += jnp.dot(x_ref[...], w_ref[...],
                            preferred_element_type=jnp.float32)

    @pl.when(pl.program_id(2) == pl.num_programs(2) - 1)
    def _():
        o_ref[...] = acc_ref[...].astype(o_ref.dtype)


def linear(x2d, w, *, out_dtype=None, tm=256, tn=512, tk=512):
    """x2d: (M, K), w: (K, N) pre-transposed weight -> (M, N).

    bf16 operands on the MXU, f32 VMEM accumulator, output cast to out_dtype.
    """
    if out_dtype is None:
        out_dtype = x2d.dtype
    x2d = x2d.astype(jnp.bfloat16)
    w = w.astype(jnp.bfloat16)
    M, K = x2d.shape
    K2, N = w.shape
    assert K == K2
    tm = _pick_tile(M, tm, 8)      # sublane axis
    tn = _pick_tile(N, tn, 128)    # lane axis (output / weight)
    tk = _pick_tile(K, tk, 128)    # lane (x) / sublane (w) axis
    grid = (M // tm, N // tn, K // tk)
    cost = pl.CostEstimate(
        flops=2 * M * N * K,
        transcendentals=0,
        bytes_accessed=(M * K + K * N) * 2 + M * N * jnp.dtype(out_dtype).itemsize)
    return pl.pallas_call(
        _matmul_kernel,
        out_shape=jax.ShapeDtypeStruct((M, N), out_dtype),
        grid_spec=pltpu.PrefetchScalarGridSpec(
            num_scalar_prefetch=0,
            grid=grid,
            in_specs=[
                pl.BlockSpec((tm, tk), lambda i, j, k: (i, k)),
                pl.BlockSpec((tk, tn), lambda i, j, k: (k, j)),
            ],
            out_specs=pl.BlockSpec((tm, tn), lambda i, j, k: (i, j)),
            scratch_shapes=[pltpu.VMEM((tm, tn), jnp.float32)],
        ),
        compiler_params=pltpu.CompilerParams(
            dimension_semantics=("parallel", "parallel", "arbitrary"),
            vmem_limit_bytes=64 * 1024 * 1024),
        cost_estimate=cost,
    )(x2d, w)


# ----------------------- flash attention (GQA-aware) ------------------------

def _flash_attn_kernel(q_ref, k_ref, v_ref, o_ref, m_scr, l_scr, acc_scr,
                       *, kv_len, block_k, mask_last):
    kb = pl.program_id(3)

    @pl.when(kb == 0)
    def _():
        m_scr[...] = jnp.full_like(m_scr, -1e30)
        l_scr[...] = jnp.zeros_like(l_scr)
        acc_scr[...] = jnp.zeros_like(acc_scr)

    q = q_ref[0]        # (tq, D) bf16, softmax scale already folded in
    k = k_ref[0, 0]     # (bk, D) bf16
    v = v_ref[0, 0]     # (bk, D) bf16

    # scores = q @ k^T (contract over head_dim, no transpose copy)
    s = lax.dot_general(q, k, (((1,), (1,)), ((), ())),
                        preferred_element_type=jnp.float32)     # (tq, bk)

    if mask_last:
        # Static: this code only exists when block_k does not divide kv_len.
        # The grid is sized by ceil(kv_len / block_k), so a block is never fully
        # masked and the online-softmax state stays well defined.
        col = kb * block_k + lax.broadcasted_iota(jnp.int32, (1, block_k), 1)
        s = jnp.where(col < kv_len, s, -1e30)

    # online softmax update (f32 VMEM scratch)
    m_prev = m_scr[...]                                          # (tq, 1)
    m_new = jnp.maximum(m_prev, jnp.max(s, axis=-1, keepdims=True))
    alpha = jnp.exp(m_prev - m_new)
    p = jnp.exp(s - m_new)
    l_scr[...] = alpha * l_scr[...] + jnp.sum(p, axis=-1, keepdims=True)
    acc_scr[...] = alpha * acc_scr[...] + jnp.dot(
        p.astype(v.dtype), v, preferred_element_type=jnp.float32)
    m_scr[...] = m_new

    @pl.when(kb == pl.num_programs(3) - 1)
    def _():
        # approx reciprocal on the EUP slot: tiny deviation from exact softmax.
        inv_l = pl.reciprocal(l_scr[...], approx=True)
        o_ref[0] = (acc_scr[...] * inv_l).astype(o_ref.dtype)


def flash_attention(q, cache_k, cache_v, *, kv_len, block_q=256, block_k=512):
    """GQA flash attention reading the bf16 KV cache in place.

    q:         (B, Hq*S, D) bf16; query heads grouped per KV head (rows
               [h*n_rep*S, (h+1)*n_rep*S) belong to KV head h), 1/sqrt(D) folded in.
    cache_k/v: (max_batch, Hkv, max_seq, D) bf16 full caches; only the first
               kv_len positions are attended (last partial block masked).
    returns    (B, Hq*S, D) bf16 in the same row layout as q.
    """
    B, HqS, D = q.shape
    _, Hkv, Lmax, _ = cache_k.shape
    assert HqS % Hkv == 0
    group = HqS // Hkv                     # n_rep * S query rows per KV head
    tq = _pick_tile(group, block_q, 8)     # sublane axis
    nq = group // tq
    bk = _pick_tile(Lmax, block_k, 8)      # divides max_seq -> block reads stay in bounds
    nkb = pl.cdiv(kv_len, bk)
    mask_last = (kv_len % bk) != 0

    kern = functools.partial(_flash_attn_kernel, kv_len=kv_len, block_k=bk,
                             mask_last=mask_last)
    cost = pl.CostEstimate(
        flops=4 * B * HqS * kv_len * D,
        transcendentals=B * HqS * kv_len,
        bytes_accessed=2 * (2 * B * HqS * D + 2 * B * Hkv * kv_len * D))
    return pl.pallas_call(
        kern,
        out_shape=jax.ShapeDtypeStruct((B, HqS, D), q.dtype),
        grid_spec=pltpu.PrefetchScalarGridSpec(
            num_scalar_prefetch=0,
            grid=(B, Hkv, nq, nkb),
            in_specs=[
                # Q tile: resident across the key axis (index_map ignores kb).
                pl.BlockSpec((1, tq, D), lambda b, h, qi, kb: (b, h * nq + qi, 0)),
                # K/V: each KV head streamed once per (b, kv-head, q-tile) — GQA
                # without jnp.repeat and without re-streaming per q head.
                # TODO(synk): sweep pipeline_mode=pl.Buffered(3) here on v7x.
                pl.BlockSpec((1, 1, bk, D), lambda b, h, qi, kb: (b, h, kb, 0)),
                pl.BlockSpec((1, 1, bk, D), lambda b, h, qi, kb: (b, h, kb, 0)),
            ],
            out_specs=pl.BlockSpec((1, tq, D), lambda b, h, qi, kb: (b, h * nq + qi, 0)),
            scratch_shapes=[
                pltpu.VMEM((tq, 1), jnp.float32),   # running max m
                pltpu.VMEM((tq, 1), jnp.float32),   # running sum l
                pltpu.VMEM((tq, D), jnp.float32),   # output accumulator
            ],
        ),
        compiler_params=pltpu.CompilerParams(
            dimension_semantics=("parallel", "parallel", "parallel", "arbitrary"),
            vmem_limit_bytes=64 * 1024 * 1024),
        cost_estimate=cost,
    )(q, cache_k, cache_v)


# ------------------------------- JAX glue -----------------------------------

def apply_rotary_pos_emb(x, freqs_cos, freqs_sin):
    """x: (B, S, H, D); freqs_cos/sin: (S, D//2). Matches torch view_as_complex rope."""
    # TODO(synk): fuse RoPE into the QKV-GEMM epilogue / flash prologue (pltpu.roll
    # on the XLU slot) to avoid the strided-slice/stack relayouts.
    xf = x.astype(jnp.float32)
    xr = xf[..., 0::2]
    xi = xf[..., 1::2]
    fc = freqs_cos[None, :, None, :]
    fs = freqs_sin[None, :, None, :]
    out_r = xr * fc - xi * fs
    out_i = xr * fs + xi * fc
    return jnp.stack([out_r, out_i], axis=-1).reshape(x.shape)


def self_attention_forward(params, x, start_pos, freqs_cos, freqs_sin,
                           cache_k, cache_v, cfg):
    """cache_k / cache_v layout: (max_batch, n_kv_heads, max_seq, head_dim), bf16.
    start_pos must be a static Python int."""
    B, S, dim = x.shape
    Hq, Hkv, D = cfg["n_heads"], cfg["n_kv_heads"], cfg["head_dim"]
    n_rep = Hq // Hkv
    assert Hq == Hkv * n_rep
    kv_dtype = cache_k.dtype

    # Fused QKV projection: one bf16 GEMM, weights pre-transposed to (K, N).
    x2d = x.reshape(B * S, dim)
    qkv = linear(x2d, params["w_qkv"], out_dtype=jnp.float32)
    q = qkv[:, : Hq * D].reshape(B, S, Hq, D)
    k = qkv[:, Hq * D: (Hq + Hkv) * D].reshape(B, S, Hkv, D)
    v = qkv[:, (Hq + Hkv) * D:].reshape(B, S, Hkv, D)

    xq = apply_rotary_pos_emb(q, freqs_cos, freqs_sin)
    xk = apply_rotary_pos_emb(k, freqs_cos, freqs_sin)

    # bf16 KV-cache write (rotated k, raw v): only the S new tokens are transposed,
    # never the long L axis; under the donating jit this update is in place.
    xk_t = jnp.transpose(xk, (0, 2, 1, 3)).astype(kv_dtype)    # (B, Hkv, S, D)
    v_t = jnp.transpose(v, (0, 2, 1, 3)).astype(kv_dtype)      # (B, Hkv, S, D)
    cache_k = lax.dynamic_update_slice(cache_k, xk_t, (0, 0, start_pos, 0))
    cache_v = lax.dynamic_update_slice(cache_v, v_t, (0, 0, start_pos, 0))

    L = start_pos + S    # static

    # Fold 1/sqrt(D) into q once (hoisted out of the key loop), group the n_rep
    # query heads of each KV head contiguously, and hand bf16 to the kernel.
    sm_scale = 1.0 / math.sqrt(D)
    xq_g = (jnp.transpose(xq, (0, 2, 1, 3)) * sm_scale).astype(jnp.bfloat16)
    xq_g = xq_g.reshape(B, Hq * S, D)   # rows ordered (kv-head, rep, seq)

    out = flash_attention(xq_g, cache_k, cache_v, kv_len=L,
                          block_q=cfg.get("block_q", 256),
                          block_k=cfg.get("block_k", 512))      # (B, Hq*S, D) bf16

    # Back to (B*S, Hq*D) for the output projection.
    out = jnp.transpose(out.reshape(B, Hq, S, D), (0, 2, 1, 3)).reshape(B * S, Hq * D)
    out = linear(out, params["wo"], out_dtype=x.dtype)
    return out.reshape(B, S, dim), cache_k, cache_v


# -------------------------------- reference ---------------------------------

def reference_forward(params, x, start_pos, freqs_cos, freqs_sin,
                      cache_k, cache_v, cfg):
    B, S, dim = x.shape
    Hq, Hkv, D = cfg["n_heads"], cfg["n_kv_heads"], cfg["head_dim"]
    n_rep = Hq // Hkv
    w_qkv = params["w_qkv"].astype(jnp.float32)
    wo = params["wo"].astype(jnp.float32)
    wq = w_qkv[:, : Hq * D]
    wk = w_qkv[:, Hq * D: (Hq + Hkv) * D]
    wv = w_qkv[:, (Hq + Hkv) * D:]

    x2d = x.reshape(B * S, dim)
    q = (x2d @ wq).reshape(B, S, Hq, D)
    k = (x2d @ wk).reshape(B, S, Hkv, D)
    v = (x2d @ wv).reshape(B, S, Hkv, D)
    xq = apply_rotary_pos_emb(q, freqs_cos, freqs_sin)
    xk = apply_rotary_pos_emb(k, freqs_cos, freqs_sin)

    cache_k = lax.dynamic_update_slice(
        cache_k, jnp.transpose(xk, (0, 2, 1, 3)).astype(cache_k.dtype),
        (0, 0, start_pos, 0))
    cache_v = lax.dynamic_update_slice(
        cache_v, jnp.transpose(v, (0, 2, 1, 3)).astype(cache_v.dtype),
        (0, 0, start_pos, 0))

    L = start_pos + S
    keys = jnp.repeat(cache_k[:B, :, :L].astype(jnp.float32), n_rep, axis=1)
    values = jnp.repeat(cache_v[:B, :, :L].astype(jnp.float32), n_rep, axis=1)

    xq_t = jnp.transpose(xq, (0, 2, 1, 3))                      # (B, Hq, S, D)
    scores = jnp.einsum("bhsd,bhld->bhsl", xq_t, keys) / math.sqrt(D)
    p = jax.nn.softmax(scores, axis=-1)
    out = jnp.einsum("bhsl,bhld->bhsd", p, values)
    out = jnp.transpose(out, (0, 2, 1, 3)).reshape(B * S, Hq * D)
    return (out @ wo).reshape(B, S, dim)


# ---------------------------------- main -------------------------------------

if __name__ == "__main__":
    cfg = dict(
        dim=32, n_heads=4, n_kv_heads=2, head_dim=8,
        max_batch_size=4, max_seq_len=16,
        # small tiles so the demo exercises the q-tile and online-softmax loops
        block_q=8, block_k=8,
    )
    B, S, start_pos = 2, 8, 5     # L = 13 -> exercises the masked last key block

    dim, Hq, Hkv, D = cfg["dim"], cfg["n_heads"], cfg["n_kv_heads"], cfg["head_dim"]

    key = jax.random.PRNGKey(0)
    kx, kqkv, ko = jax.random.split(key, 3)

    # Weights stored pre-transposed as (in_features, out_features), bf16, qkv fused.
    params = {
        "w_qkv": (0.02 * jax.random.normal(
            kqkv, (dim, (Hq + 2 * Hkv) * D), jnp.float32)).astype(jnp.bfloat16),
        "wo": (0.02 * jax.random.normal(
            ko, (Hq * D, dim), jnp.float32)).astype(jnp.bfloat16),
    }
    x = jax.random.normal(kx, (B, S, dim), jnp.float32)

    # Rotary frequencies for positions [start_pos, start_pos + S)
    theta = 10000.0
    inv_freq = 1.0 / (theta ** (jnp.arange(0, D, 2, dtype=jnp.float32) / D))
    t = jnp.arange(start_pos, start_pos + S, dtype=jnp.float32)
    angles = jnp.outer(t, inv_freq)                   # (S, D//2)
    freqs_cos, freqs_sin = jnp.cos(angles), jnp.sin(angles)

    # bf16 KV caches in (max_batch, n_kv_heads, max_seq, head_dim) layout.
    cache_k = jnp.zeros((cfg["max_batch_size"], Hkv, cfg["max_seq_len"], D),
                        jnp.bfloat16)
    cache_v = jnp.zeros_like(cache_k)

    # Reference (f32 math, same bf16 cache quantization) BEFORE donating the caches.
    ref = reference_forward(params, x, start_pos, freqs_cos, freqs_sin,
                            cache_k, cache_v, cfg)

    # Donate the caches so the dynamic_update_slice is a true in-place update.
    @functools.partial(jax.jit, donate_argnums=(4, 5))
    def fwd(p, xx, fc, fs, ck, cv):
        return self_attention_forward(p, xx, start_pos, fc, fs, ck, cv, cfg)

    out, new_ck, new_cv = fwd(params, x, freqs_cos, freqs_sin, cache_k, cache_v)
    out = jax.block_until_ready(out)

    assert out.shape == (B, S, dim)
    assert jnp.allclose(out, ref, atol=2e-2, rtol=2e-2), \
        float(jnp.max(jnp.abs(out - ref)))
    print("KERNEL_OK")
</pallas_src>

<mosaic_0001>
module attributes {stable_mosaic.version = 11 : i64} {
  func.func @_matmul_kernel(%arg0: i32, %arg1: i32, %arg2: i32, %arg3: memref<16x32xbf16, #tpu.memory_space<vmem>>, %arg4: memref<32x64xbf16, #tpu.memory_space<vmem>>, %arg5: memref<16x64xf32, #tpu.memory_space<vmem>>, %arg6: memref<16x64xf32, #tpu.memory_space<vmem>>) attributes {dimension_semantics = [#tpu.dimension_semantics<parallel>, #tpu.dimension_semantics<parallel>, #tpu.dimension_semantics<arbitrary>], iteration_bounds = array<i64: 1, 1, 1>, scalar_prefetch = 0 : i64, scratch_operands = 1 : i64, tpu.core_type = #tpu.core_type<tc>, window_params = [{transform_indices = @transform_0, window_bounds = array<i64: 16, 32>}, {transform_indices = @transform_1, window_bounds = array<i64: 32, 64>}, {transform_indices = @transform_2, window_bounds = array<i64: 16, 64>}]} {
    %c0_i32 = arith.constant 0 : i32
    %0 = arith.cmpi eq, %arg2, %c0_i32 : i32
    %1 = arith.extui %0 : i1 to i32
    %c0_i32_0 = arith.constant 0 : i32
    %2 = arith.cmpi ne, %1, %c0_i32_0 : i32
    scf.if %2 {
      %cst_10 = arith.constant 0.000000e+00 : f32
      %12 = vector.broadcast %cst_10 : f32 to vector<16x64xf32>
      %c0_11 = arith.constant 0 : index
      %c0_12 = arith.constant 0 : index
      %13 = vector.load %arg6[%c0_11, %c0_12] : memref<16x64xf32, #tpu.memory_space<vmem>>, vector<16x64xf32>
      tpu.vector_store %arg6[%c0_11, %c0_12], %12 {strides = array<i32>} : memref<16x64xf32, #tpu.memory_space<vmem>>, vector<16x64xf32>,
    } else {
    }
    %c0 = arith.constant 0 : index
    %c0_1 = arith.constant 0 : index
    %3 = vector.load %arg6[%c0, %c0_1] : memref<16x64xf32, #tpu.memory_space<vmem>>, vector<16x64xf32>
    %c0_2 = arith.constant 0 : index
    %c0_3 = arith.constant 0 : index
    %4 = vector.load %arg3[%c0_2, %c0_3] : memref<16x32xbf16, #tpu.memory_space<vmem>>, vector<16x32xbf16>
    %c0_4 = arith.constant 0 : index
    %c0_5 = arith.constant 0 : index
    %5 = vector.load %arg4[%c0_4, %c0_5] : memref<32x64xbf16, #tpu.memory_space<vmem>>, vector<32x64xbf16>
    %cst = arith.constant dense<0.000000e+00> : vector<16x64xf32>
    %6 = tpu.matmul %4, %5, %cst {dimension_numbers = #tpu.dot_dimension_numbers<[1], [0], [0], [1], [0, 0, 1, 1], [], []>} : vector<16x32xbf16>, vector<32x64xbf16>, vector<16x64xf32> -> vector<16x64xf32>
    %7 = arith.addf %3, %6 : vector<16x64xf32>
    %c0_6 = arith.constant 0 : index
    %c0_7 = arith.constant 0 : index
    %8 = vector.load %arg6[%c0_6, %c0_7] : memref<16x64xf32, #tpu.memory_space<vmem>>, vector<16x64xf32>
    tpu.vector_store %arg6[%c0_6, %c0_7], %7 {strides = array<i32>} : memref<16x64xf32, #tpu.memory_space<vmem>>, vector<16x64xf32>,
    %c0_i32_8 = arith.constant 0 : i32
    %9 = arith.cmpi eq, %arg2, %c0_i32_8 : i32
    %10 = arith.extui %9 : i1 to i32
    %c0_i32_9 = arith.constant 0 : i32
    %11 = arith.cmpi ne, %10, %c0_i32_9 : i32
    scf.if %11 {
      %c0_10 = arith.constant 0 : index
      %c0_11 = arith.constant 0 : index
      %12 = vector.load %arg6[%c0_10, %c0_11] : memref<16x64xf32, #tpu.memory_space<vmem>>, vector<16x64xf32>
      %c0_12 = arith.constant 0 : index
      %c0_13 = arith.constant 0 : index
      %13 = vector.load %arg5[%c0_12, %c0_13] : memref<16x64xf32, #tpu.memory_space<vmem>>, vector<16x64xf32>
      tpu.vector_store %arg5[%c0_12, %c0_13], %12 {strides = array<i32>} : memref<16x64xf32, #tpu.memory_space<vmem>>, vector<16x64xf32>,
    } else {
    }
    return
  }
  func.func @transform_0(%arg0: i32, %arg1: i32, %arg2: i32) -> (i32, i32) {
    %c0_i32 = arith.constant 0 : i32
    return %arg0, %arg2 : i32, i32
  }
  func.func @transform_1(%arg0: i32, %arg1: i32, %arg2: i32) -> (i32, i32) {
    %c0_i32 = arith.constant 0 : i32
    return %arg2, %arg1 : i32, i32
  }
  func.func @transform_2(%arg0: i32, %arg1: i32, %arg2: i32) -> (i32, i32) {
    %c0_i32 = arith.constant 0 : i32
    return %arg0, %arg1 : i32, i32
  }
}

module attributes {stable_mosaic.version = 11 : i64} {
  func.func @_flash_attn_kernel(%arg0: i32, %arg1: i32, %arg2: i32, %arg3: i32, %arg4: memref<1x8x8xbf16, #tpu.memory_space<vmem>>, %arg5: memref<1x1x8x8xbf16, #tpu.memory_space<vmem>>, %arg6: memref<1x1x8x8xbf16, #tpu.memory_space<vmem>>, %arg7: memref<1x8x8xbf16, #tpu.memory_space<vmem>>, %arg8: memref<8x1xf32, #tpu.memory_space<vmem>>, %arg9: memref<8x1xf32, #tpu.memory_space<vmem>>, %arg10: memref<8x8xf32, #tpu.memory_space<vmem>>) attributes {dimension_semantics = [#tpu.dimension_semantics<parallel>, #tpu.dimension_semantics<parallel>, #tpu.dimension_semantics<parallel>, #tpu.dimension_semantics<arbitrary>], iteration_bounds = array<i64: 2, 2, 2, 2>, scalar_prefetch = 0 : i64, scratch_operands = 3 : i64, tpu.core_type = #tpu.core_type<tc>, window_params = [{transform_indices = @transform_0, window_bounds = array<i64: 1, 8, 8>}, {transform_indices = @transform_1, window_bounds = array<i64: 1, 1, 8, 8>}, {transform_indices = @transform_2, window_bounds = array<i64: 1, 1, 8, 8>}, {transform_indices = @transform_3, window_bounds = array<i64: 1, 8, 8>}]} {
    %c0_i32 = arith.constant 0 : i32
    %0 = arith.cmpi eq, %arg3, %c0_i32 : i32
    %1 = arith.extui %0 : i1 to i32
    %c0_i32_0 = arith.constant 0 : i32
    %2 = arith.cmpi ne, %1, %c0_i32_0 : i32
    scf.if %2 {
      %cst_28 = arith.constant -1.000000e+30 : f32
      %46 = vector.broadcast %cst_28 : f32 to vector<8x1xf32>
      %c0_29 = arith.constant 0 : index
      %c0_30 = arith.constant 0 : index
      %47 = vector.load %arg8[%c0_29, %c0_30] : memref<8x1xf32, #tpu.memory_space<vmem>>, vector<8x1xf32>
      tpu.vector_store %arg8[%c0_29, %c0_30], %46 {strides = array<i32>} : memref<8x1xf32, #tpu.memory_space<vmem>>, vector<8x1xf32>,
      %cst_31 = arith.constant 0.000000e+00 : f32
      %48 = vector.broadcast %cst_31 : f32 to vector<8x1xf32>
      %c0_32 = arith.constant 0 : index
      %c0_33 = arith.constant 0 : index
      %49 = vector.load %arg9[%c0_32, %c0_33] : memref<8x1xf32, #tpu.memory_space<vmem>>, vector<8x1xf32>
      tpu.vector_store %arg9[%c0_32, %c0_33], %48 {strides = array<i32>} : memref<8x1xf32, #tpu.memory_space<vmem>>, vector<8x1xf32>,
      %cst_34 = arith.constant 0.000000e+00 : f32
      %50 = vector.broadcast %cst_34 : f32 to vector<8x8xf32>
      %c0_35 = arith.constant 0 : index
      %c0_36 = arith.constant 0 : index
      %51 = vector.load %arg10[%c0_35, %c0_36] : memref<8x8xf32, #tpu.memory_space<vmem>>, vector<8x8xf32>
      tpu.vector_store %arg10[%c0_35, %c0_36], %50 {strides = array<i32>} : memref<8x8xf32, #tpu.memory_space<vmem>>, vector<8x8xf32>,
    } else {
    }
    %c0 = arith.constant 0 : index
    %c0_1 = arith.constant 0 : index
    %c0_2 = arith.constant 0 : index
    %3 = vector.load %arg4[%c0, %c0_1, %c0_2] : memref<1x8x8xbf16, #tpu.memory_space<vmem>>, vector<1x8x8xbf16>
    %4 = vector.shape_cast %3 : vector<1x8x8xbf16> to vector<8x8xbf16>
    %c0_3 = arith.constant 0 : index
    %c0_4 = arith.constant 0 : index
    %c0_5 = arith.constant 0 : index
    %c0_6 = arith.constant 0 : index
    %5 = vector.load %arg5[%c0_3, %c0_4, %c0_5, %c0_6] : memref<1x1x8x8xbf16, #tpu.memory_space<vmem>>, vector<1x1x8x8xbf16>
    %6 = vector.shape_cast %5 : vector<1x1x8x8xbf16> to vector<8x8xbf16>
    %c0_7 = arith.constant 0 : index
    %c0_8 = arith.constant 0 : index
    %c0_9 = arith.constant 0 : index
    %c0_10 = arith.constant 0 : index
    %7 = vector.load %arg6[%c0_7, %c0_8, %c0_9, %c0_10] : memref<1x1x8x8xbf16, #tpu.memory_space<vmem>>, vector<1x1x8x8xbf16>
    %8 = vector.shape_cast %7 : vector<1x1x8x8xbf16> to vector<8x8xbf16>
    %cst = arith.constant dense<0.000000e+00> : vector<8x8xf32>
    %9 = tpu.matmul %4, %6, %cst {dimension_numbers = #tpu.dot_dimension_numbers<[1], [1], [0], [0], [0, 0, 1, 0], [], []>} : vector<8x8xbf16>, vector<8x8xbf16>, vector<8x8xf32> -> vector<8x8xf32>
    %c8_i32 = arith.constant 8 : i32
    %10 = arith.muli %arg3, %c8_i32 : i32
    %11 = tpu.iota {dimensions = array<i32: 1>} : vector<1x8xi32>
    %12 = vector.broadcast %10 : i32 to vector<1x8xi32>
    %13 = arith.addi %12, %11 : vector<1x8xi32>
    %c13_i32 = arith.constant 13 : i32
    %14 = vector.broadcast %c13_i32 : i32 to vector<1x8xi32>
    %15 = arith.cmpi slt, %13, %14 : vector<1x8xi32>
    %cst_11 = arith.constant -1.000000e+30 : f32
    %16 = vector.shape_cast %15 : vector<1x8xi1> to vector<1x8xi1>
    %17 = vector.broadcast %16 : vector<1x8xi1> to vector<8x8xi1>
    %18 = vector.broadcast %cst_11 : f32 to vector<8x8xf32>
    %19 = arith.select %17, %9, %18 : vector<8x8xi1>, vector<8x8xf32>
    %c0_12 = arith.constant 0 : index
    %c0_13 = arith.constant 0 : index
    %20 = vector.load %arg8[%c0_12, %c0_13] : memref<8x1xf32, #tpu.memory_space<vmem>>, vector<8x1xf32>
    %cst_14 = arith.constant dense<0xFF800000> : vector<8xf32>
    %21 = vector.multi_reduction <maximumf>, %19, %cst_14 [1] : vector<8x8xf32> to vector<8xf32>
    %22 = vector.shape_cast %21 : vector<8xf32> to vector<8x1xf32>
    %23 = arith.maximumf %20, %22 : vector<8x1xf32>
    %24 = arith.subf %20, %23 : vector<8x1xf32>
    %25 = math.exp %24 : vector<8x1xf32>
    %26 = vector.broadcast %23 : vector<8x1xf32> to vector<8x8xf32>
    %27 = arith.subf %19, %26 : vector<8x8xf32>
    %28 = math.exp %27 : vector<8x8xf32>
    %c0_15 = arith.constant 0 : index
    %c0_16 = arith.constant 0 : index
    %29 = vector.load %arg9[%c0_15, %c0_16] : memref<8x1xf32, #tpu.memory_space<vmem>>, vector<8x1xf32>
    %30 = arith.mulf %25, %29 : vector<8x1xf32>
    %cst_17 = arith.constant dense<0.000000e+00> : vector<8xf32>
    %31 = vector.multi_reduction <add>, %28, %cst_17 [1] : vector<8x8xf32> to vector<8xf32>
    %32 = vector.shape_cast %31 : vector<8xf32> to vector<8x1xf32>
    %33 = arith.addf %30, %32 : vector<8x1xf32>
    %c0_18 = arith.constant 0 : index
    %c0_19 = arith.constant 0 : index
    %34 = vector.load %arg9[%c0_18, %c0_19] : memref<8x1xf32, #tpu.memory_space<vmem>>, vector<8x1xf32>
    tpu.vector_store %arg9[%c0_18, %c0_19], %33 {strides = array<i32>} : memref<8x1xf32, #tpu.memory_space<vmem>>, vector<8x1xf32>,
    %c0_20 = arith.constant 0 : index
    %c0_21 = arith.constant 0 : index
    %35 = vector.load %arg10[%c0_20, %c0_21] : memref<8x8xf32, #tpu.memory_space<vmem>>, vector<8x8xf32>
    %36 = vector.broadcast %25 : vector<8x1xf32> to vector<8x8xf32>
    %37 = arith.mulf %36, %35 : vector<8x8xf32>
    %38 = arith.truncf %28 : vector<8x8xf32> to vector<8x8xbf16>
    %cst_22 = arith.constant dense<0.000000e+00> : vector<8x8xf32>
    %39 = tpu.matmul %38, %8, %cst_22 {dimension_numbers = #tpu.dot_dimension_numbers<[1], [0], [0], [1], [0, 0, 1, 1], [], []>} : vector<8x8xbf16>, vector<8x8xbf16>, vector<8x8xf32> -> vector<8x8xf32>
    %40 = arith.addf %37, %39 : vector<8x8xf32>
    %c0_23 = arith.constant 0 : index
    %c0_24 = arith.constant 0 : index
    %41 = vector.load %arg10[%c0_23, %c0_24] : memref<8x8xf32, #tpu.memory_space<vmem>>, vector<8x8xf32>
    tpu.vector_store %arg10[%c0_23, %c0_24], %40 {strides = array<i32>} : memref<8x8xf32, #tpu.memory_space<vmem>>, vector<8x8xf32>,
    %c0_25 = arith.constant 0 : index
    %c0_26 = arith.constant 0 : index
    %42 = vector.load %arg8[%c0_25, %c0_26] : memref<8x1xf32, #tpu.memory_space<vmem>>, vector<8x1xf32>
    tpu.vector_store %arg8[%c0_25, %c0_26], %23 {strides = array<i32>} : memref<8x1xf32, #tpu.memory_space<vmem>>, vector<8x1xf32>,
    %c1_i32 = arith.constant 1 : i32
    %43 = arith.cmpi eq, %arg3, %c1_i32 : i32
    %44 = arith.extui %43 : i1 to i32
    %c0_i32_27 = arith.constant 0 : i32
    %45 = arith.cmpi ne, %44, %c0_i32_27 : i32
    scf.if %45 {
      %c0_28 = arith.constant 0 : index
      %c0_29 = arith.constant 0 : index
      %46 = vector.load %arg9[%c0_28, %c0_29] : memref<8x1xf32, #tpu.memory_space<vmem>>, vector<8x1xf32>
      %47 = tpu.reciprocal %46 {approx = true} : vector<8x1xf32> -> vector<8x1xf32>
      %c0_30 = arith.constant 0 : index
      %c0_31 = arith.constant 0 : index
      %48 = vector.load %arg10[%c0_30, %c0_31] : memref<8x8xf32, #tpu.memory_space<vmem>>, vector<8x8xf32>
      %49 = vector.broadcast %47 : vector<8x1xf32> to vector<8x8xf32>
      %50 = arith.mulf %48, %49 : vector<8x8xf32>
      %51 = arith.truncf %50 : vector<8x8xf32> to vector<8x8xbf16>
      %c0_32 = arith.constant 0 : index
      %c0_33 = arith.constant 0 : index
      %c0_34 = arith.constant 0 : index
      %52 = vector.load %arg7[%c0_32, %c0_33, %c0_34] : memref<1x8x8xbf16, #tpu.memory_space<vmem>>, vector<1x8x8xbf16>
      %53 = vector.shape_cast %52 : vector<1x8x8xbf16> to vector<8x8xbf16>
      %54 = vector.shape_cast %51 : vector<8x8xbf16> to vector<1x8x8xbf16>
      tpu.vector_store %arg7[%c0_32, %c0_33, %c0_34], %54 {strides = array<i32>} : memref<1x8x8xbf16, #tpu.memory_space<vmem>>, vector<1x8x8xbf16>,
    } else {
    }
    return
  }
  func.func @transform_0(%arg0: i32, %arg1: i32, %arg2: i32, %arg3: i32) -> (i32, i32, i32) {
    %c2_i32 = arith.constant 2 : i32
    %0 = arith.muli %arg1, %c2_i32 : i32
    %1 = arith.addi %0, %arg2 : i32
    %c0_i32 = arith.constant 0 : i32
    %c0_i32_0 = arith.constant 0 : i32
    return %arg0, %1, %c0_i32 : i32, i32, i32
  }
  func.func @transform_1(%arg0: i32, %arg1: i32, %arg2: i32, %arg3: i32) -> (i32, i32, i32, i32) {
    %c0_i32 = arith.constant 0 : i32
    %c0_i32_0 = arith.constant 0 : i32
    return %arg0, %arg1, %arg3, %c0_i32 : i32, i32, i32, i32
  }
  func.func @transform_2(%arg0: i32, %arg1: i32, %arg2: i32, %arg3: i32) -> (i32, i32, i32, i32) {
    %c0_i32 = arith.constant 0 : i32
    %c0_i32_0 = arith.constant 0 : i32
    return %arg0, %arg1, %arg3, %c0_i32 : i32, i32, i32, i32
  }
  func.func @transform_3(%arg0: i32, %arg1: i32, %arg2: i32, %arg3: i32) -> (i32, i32, i32) {
    %c2_i32 = arith.constant 2 : i32
    %0 = arith.muli %arg1, %c2_i32 : i32
    %1 = arith.addi %0, %arg2 : i32
    %c0_i32 = arith.constant 0 : i32
    %c0_i32_0 = arith.constant 0 : i32
    return %arg0, %1, %c0_i32 : i32, i32, i32
  }
}

module attributes {stable_mosaic.version = 11 : i64} {
  func.func @_matmul_kernel(%arg0: i32, %arg1: i32, %arg2: i32, %arg3: memref<16x32xbf16, #tpu.memory_space<vmem>>, %arg4: memref<32x32xbf16, #tpu.memory_space<vmem>>, %arg5: memref<16x32xf32, #tpu.memory_space<vmem>>, %arg6: memref<16x32xf32, #tpu.memory_space<vmem>>) attributes {dimension_semantics = [#tpu.dimension_semantics<parallel>, #tpu.dimension_semantics<parallel>, #tpu.dimension_semantics<arbitrary>], iteration_bounds = array<i64: 1, 1, 1>, scalar_prefetch = 0 : i64, scratch_operands = 1 : i64, tpu.core_type = #tpu.core_type<tc>, window_params = [{transform_indices = @transform_0, window_bounds = array<i64: 16, 32>}, {transform_indices = @transform_1, window_bounds = array<i64: 32, 32>}, {transform_indices = @transform_2, window_bounds = array<i64: 16, 32>}]} {
    %c0_i32 = arith.constant 0 : i32
    %0 = arith.cmpi eq, %arg2, %c0_i32 : i32
    %1 = arith.extui %0 : i1 to i32
    %c0_i32_0 = arith.constant 0 : i32
    %2 = arith.cmpi ne, %1, %c0_i32_0 : i32
    scf.if %2 {
      %cst_10 = arith.constant 0.000000e+00 : f32
      %12 = vector.broadcast %cst_10 : f32 to vector<16x32xf32>
      %c0_11 = arith.constant 0 : index
      %c0_12 = arith.constant 0 : index
      %13 = vector.load %arg6[%c0_11, %c0_12] : memref<16x32xf32, #tpu.memory_space<vmem>>, vector<16x32xf32>
      tpu.vector_store %arg6[%c0_11, %c0_12], %12 {strides = array<i32>} : memref<16x32xf32, #tpu.memory_space<vmem>>, vector<16x32xf32>,
    } else {
    }
    %c0 = arith.constant 0 : index
    %c0_1 = arith.constant 0 : index
    %3 = vector.load %arg6[%c0, %c0_1] : memref<16x32xf32, #tpu.memory_space<vmem>>, vector<16x32xf32>
    %c0_2 = arith.constant 0 : index
    %c0_3 = arith.constant 0 : index
    %4 = vector.load %arg3[%c0_2, %c0_3] : memref<16x32xbf16, #tpu.memory_space<vmem>>, vector<16x32xbf16>
    %c0_4 = arith.constant 0 : index
    %c0_5 = arith.constant 0 : index
    %5 = vector.load %arg4[%c0_4, %c0_5] : memref<32x32xbf16, #tpu.memory_space<vmem>>, vector<32x32xbf16>
    %cst = arith.constant dense<0.000000e+00> : vector<16x32xf32>
    %6 = tpu.matmul %4, %5, %cst {dimension_numbers = #tpu.dot_dimension_numbers<[1], [0], [0], [1], [0, 0, 1, 1], [], []>} : vector<16x32xbf16>, vector<32x32xbf16>, vector<16x32xf32> -> vector<16x32xf32>
    %7 = arith.addf %3, %6 : vector<16x32xf32>
    %c0_6 = arith.constant 0 : index
    %c0_7 = arith.constant 0 : index
    %8 = vector.load %arg6[%c0_6, %c0_7] : memref<16x32xf32, #tpu.memory_space<vmem>>, vector<16x32xf32>
    tpu.vector_store %arg6[%c0_6, %c0_7], %7 {strides = array<i32>} : memref<16x32xf32, #tpu.memory_space<vmem>>, vector<16x32xf32>,
    %c0_i32_8 = arith.constant 0 : i32
    %9 = arith.cmpi eq, %arg2, %c0_i32_8 : i32
    %10 = arith.extui %9 : i1 to i32
    %c0_i32_9 = arith.constant 0 : i32
    %11 = arith.cmpi ne, %10, %c0_i32_9 : i32
    scf.if %11 {
      %c0_10 = arith.constant 0 : index
      %c0_11 = arith.constant 0 : index
      %12 = vector.load %arg6[%c0_10, %c0_11] : memref<16x32xf32, #tpu.memory_space<vmem>>, vector<16x32xf32>
      %c0_12 = arith.constant 0 : index
      %c0_13 = arith.constant 0 : index
      %13 = vector.load %arg5[%c0_12, %c0_13] : memref<16x32xf32, #tpu.memory_space<vmem>>, vector<16x32xf32>
      tpu.vector_store %arg5[%c0_12, %c0_13], %12 {strides = array<i32>} : memref<16x32xf32, #tpu.memory_space<vmem>>, vector<16x32xf32>,
    } else {
    }
    return
  }
  func.func @transform_0(%arg0: i32, %arg1: i32, %arg2: i32) -> (i32, i32) {
    %c0_i32 = arith.constant 0 : i32
    return %arg0, %arg2 : i32, i32
  }
  func.func @transform_1(%arg0: i32, %arg1: i32, %arg2: i32) -> (i32, i32) {
    %c0_i32 = arith.constant 0 : i32
    return %arg2, %arg1 : i32, i32
  }
  func.func @transform_2(%arg0: i32, %arg1: i32, %arg2: i32) -> (i32, i32) {
    %c0_i32 = arith.constant 0 : i32
    return %arg0, %arg1 : i32, i32
  }
}

</mosaic_0001>

<bundles_post_ra>
// kernel: fwd.3
= control target key start
LH: loop header
LB: loop body
LE: loop exit
PB: predicated region body
PF: predicated region fallthrough
CT: control target
= control target key end

     0   :  { %vm16_vm0 = vcmask 523264   ;;  %v95_v1 = vmov 0.0   ;;  %vm44_vm1 = vcmask 261120   ;;  %s132_s1 = inlined_call_operand.vmem [shape: bf16[32,64], index: 1, kind: input, shape index: {}]   ;;  %s133_s0 = inlined_call_operand.vmem [shape: bf16[16,32], index: 0, kind: input, shape index: {}]   ;;  %s134_s2 = inlined_call_operand.vmem [shape: f32[16,64], index: 2, kind: output, shape index: {}]  }
   0x1   :  { %v93_v0 = vld [vmem:[%s132_s1 + $0x8] sm:$0xff]  ;;  %17 = vst.msk [vmem:[#allocation2] sm:$0xff] %vm16_vm0, %v95_v1  ;;  %v92_v2 = vld [vmem:[%s132_s1] sm:$0xff] }
   0x2   :  { %18 = vst.msk [vmem:[#allocation2 + $0x8] sm:$0xff] %vm16_vm0, %v95_v1  ;;  %54 = vmatpush.bf16.msra.mxu0 %v93_v0  ;;  %v91_v3 = vld [vmem:[%s133_s0] sm:$0xff] }
   0x6   :  { %55 = vmatpush.bf16.msra.mxu0 %v92_v2 }
   0x8   :  { %v19_v4 = vld [vmem:[#allocation2] sm:$0xff] }
   0x9   :  { %90 = vmatmul.msk.bf16.vlgmr.msra.gmra.mxu0 %vm44_vm1, %v91_v3  ;;  %v20_v7 = vld [vmem:[#allocation2 + $0x8] sm:$0xff] }
  0x86   :  { %v57_v5 = vpop.f32.mrf.mxu0 }
  0x87   :  { %v62_v6 = vadd.f32 %v57_v5, %v19_v4 }
  0x89   :  { %65 = vst.msk [vmem:[#allocation2] sm:$0xff] %vm16_vm0, %v62_v6 }
  0x8e   :  { %v59_v8 = vpop.f32.mrf.mxu0 }
  0x8f   :  { %v63_v9 = vadd.f32 %v59_v8, %v20_v7 }
  0x90   :  { %v70_v10 = vld [vmem:[#allocation2] sm:$0xff] }
  0x91   :  { %72 = vst.msk [vmem:[%s134_s2] sm:$0xff] %vm16_vm0, %v70_v10 }
  0x92   :  { %66 = vst.msk [vmem:[#allocation2 + $0x8] sm:$0xff] %vm16_vm0, %v63_v9 }
  0x99   :  { %v71_v11 = vld [vmem:[#allocation2 + $0x8] sm:$0xff] }
  0x9a   :  { %73 = vst.msk [vmem:[%s134_s2 + $0x8] sm:$0xff] %vm16_vm0, %v71_v11 }

// kernel: fwd.5
= control target key start
LH: loop header
LB: loop body
LE: loop exit
PB: predicated region body
PF: predicated region fallthrough
CT: control target
= control target key end

     0   :  { %vm17_vm0 = vcmask 261120   ;;  %v138_v1 = vmov 0.0   ;;  %s176_s0 = inlined_call_operand.vmem [shape: bf16[16,32], index: 0, kind: input, shape index: {}]   ;;  %s177_s1 = inlined_call_operand.vmem [shape: bf16[32,32], index: 1, kind: input, shape index: {}]   ;;  %s178_s2 = inlined_call_operand.hbm [shape: f32[16,32], index: 2, kind: output, shape index: {}]  }
   0x1   :  { %v107_v0 = vld [vmem:[%s177_s1 + $0x8] sm:$0xff]  ;;  %18 = vst.msk [vmem:[#allocation2] sm:$0xff] %vm17_vm0, %v138_v1 }
   0x2   :  { %7 = vsyncpa [#allocation4], 0  ;;  %55 = vmatpush.bf16.msra.mxu0 %v107_v0  ;;  %v106_v2 = vld [vmem:[%s177_s1] sm:$0xff]  ;;  %19 = vst.msk [vmem:[#allocation2 + $0x8] sm:$0xff] %vm17_vm0, %v138_v1  ;;  %s139_s1 = smov [#allocation3]   ;;  %s80_s17 = sshll.u32 %s178_s2, 4  ;;  %s81_s17 = int_to_ptr.hbm [resolvable:$true] %s80_s17 }
   0x3   :  { %v105_v3 = vld [vmem:[%s176_s0] sm:$0xff]  ;;  %s78_s15 = sshll.u32 %s139_s1, 4  ;;  %s140_s18 = smov 128   ;;  %s79_s15 = int_to_ptr.vmem [resolvable:$true] %s78_s15 }
   0x4   :  { %s141_s19 = smov 8  }
   0x6   :  { %56 = vmatpush.bf16.msra.mxu0 %v106_v2 }
   0x8   :  { %v20_v4 = vld [vmem:[#allocation2] sm:$0xff] }
   0x9   :  { %104 = vmatmul.msk.bf16.vlgmr.msra.gmra.mxu0 %vm17_vm0, %v105_v3  ;;  %v21_v7 = vld [vmem:[#allocation2 + $0x8] sm:$0xff] }
  0x86   :  { %v58_v5 = vpop.f32.mrf.mxu0 }
  0x87   :  { %v63_v6 = vadd.f32 %v58_v5, %v20_v4 }
  0x89   :  { %65 = vst.msk [vmem:[#allocation2] sm:$0xff] %vm17_vm0, %v63_v6 }
  0x8e   :  { %v60_v8 = vpop.f32.mrf.mxu0 }
  0x8f   :  { %v64_v9 = vadd.f32 %v60_v8, %v21_v7 }
  0x90   :  { %v70_v10 = vld [vmem:[#allocation2] sm:$0xff] }
  0x91   :  { %66 = vst.msk [vmem:[#allocation2 + $0x8] sm:$0xff] %vm17_vm0, %v64_v9 }
  0x92   :  { %72 = vst.msk [vmem:[#allocation3] sm:$0xff] %vm17_vm0, %v70_v10 }
  0x98   :  { %v71_v11 = vld [vmem:[#allocation2 + $0x8] sm:$0xff] }
  0x99   :  { %73 = vst.msk [vmem:[#allocation3 + $0x8] sm:$0xff] %vm17_vm0, %v71_v11 }
  0x9a   :  { %86 = dma.vmem_to_hbm [thread:$0]  %s79_s15, 256, %s81_s17, [#allocation4], %s140_s18, %s140_s18, %s141_s19  }
  0x9b   :  { %136 = dma.done.wait [#allocation4], 256  }
  0x9c   :  { %137 = vsyncadd [#allocation4], 4294967040 }
  0x9d   :  { %91 = vsyncpa [#allocation4], 1 }

// kernel: fwd.4
= control target key start
LH: loop header
LB: loop body
LE: loop exit
PB: predicated region body
PF: predicated region fallthrough
CT: control target
= control target key end

     0   :  { %s805_s12 = smov 0   ;;  %s807_s13 = smov 0   ;;  %s933_s0 = inlined_call_operand.vmem [shape: bf16[2,32,8], index: 0, kind: input, shape index: {}]   ;;  %s934_s1 = inlined_call_operand.vmem [shape: bf16[4,2,16,8], index: 1, kind: input, shape index: {}]   ;;  %s935_s2 = inlined_call_operand.vmem [shape: bf16[4,2,16,8], index: 2, kind: input, shape index: {}]   ;;  %s936_s3 = inlined_call_operand.vmem [shape: bf16[2,32,8], index: 3, kind: output, shape index: {}]  }
   0x1   :  { %s809_s14 = smov 0   ;;  %s811_s15 = smov 0  }
   0x2   :  { %s813_s16 = smov 0   ;;  %s815_s17 = smov 0  }
   0x3   :  { %s817_s18 = smov 0   ;;  %s819_s19 = smov 0  }
   0x4   :  { %s821_s20 = smov 0  }
   0x5 LB: > { %s28_s21 = sadd.s32 1, %s763_s16  ;;  %s31_s22 = sadd.s32 1, %s767_s17  ;;  %s779_s20 = sphi %s821_s20, %s13_s20   ;;  %s775_s19 = sphi %s819_s19, %s948_s19   ;;  %s771_s18 = sphi %s817_s18, %s947_s18   ;;  %s767_s17 = sphi %s815_s17, %s946_s17   ;;  %s763_s16 = sphi %s813_s16, %s945_s16   ;;  %s759_s15 = sphi %s811_s15, %s944_s15   ;;  %s755_s14 = sphi %s809_s14, %s943_s14   ;;  %s751_s13 = sphi %s807_s13, %s942_s13   ;;  %s747_s12 = sphi %s805_s12, %s941_s12  }
   0x6   : > { %p29_p0 = scmp.ge.s32.totalorder %s28_s21, 2  ;;  %p604_p1 = scmp.ge.s32.totalorder %s779_s20, 1 }
   0x7   : > { %p224_p2 = scmp.lt.s32.totalorder %s779_s20, 17  ;;  %s35_s23 = sadd.s32 1, %s771_s18 }
   0x8   : > { %s950_s21 = smov (%p29_p0, %s28_s21), 0  ;;  %s952_s22 = smov (!%p29_p0, %s31_s22), %s767_s17 }
   0x9   : > { %p33_p3 = scmp.ge.s32.totalorder %s952_s22, 2  ;;  %p225_p4 = pnand %p604_p1, %p224_p2 }
   0xa   : > { %s39_s24 = sadd.s32 1, %s775_s19  ;;  %s605_s25 = sshll.u32 (!%p225_p4), %s755_s14, 1 }
   0xb   : > { %s954_s22 = smov (%p33_p3, %s952_s22), 0  ;;  %s956_s23 = smov (!%p33_p3, %s35_s23), %s771_s18 }
   0xc   : > { %p37_p5 = scmp.ge.s32.totalorder %s956_s23, 2  ;;  %p284_p7 = scmp.lt.s32.totalorder (!%p225_p4), %s759_s15, 1 }
   0xd   : > { %s283_s26 = sadd.s32 (!%p225_p4), %s751_s13, %s605_s25  ;;  %p294_p8 = scmp.lt.s32.totalorder (!%p225_p4), %s759_s15, 3 }
   0xe   : > { %s958_s23 = smov (%p37_p5, %s956_s23), 0  ;;  %s960_s24 = smov (!%p37_p5, %s39_s24), %s775_s19 }
   0xf   : > { %937 = sst [smem:[#allocation5_spill]] %s958_s23  ;;  %p41_p6 = scmp.ge.s32.totalorder %s960_s24, 2 }
  0x10   : > { %228 = sbr.rel (%p225_p4) target bundleno = 682 (0x2aa), region = 32  ;;  %p286_p9 = scmp.lt.s32.totalorder (!%p225_p4), %s283_s26, 3 }
  0x11   : > { %s962_s24 = smov (%p41_p6, %s960_s24), 0  ;;  %p296_p10 = scmp.lt.s32.totalorder (!%p225_p4), %s755_s14, 1 }
  0x12   : > { %938 = sst [smem:[#allocation6_spill]] %s962_s24  ;;  %p298_p11 = scmp.lt.s32.totalorder (!%p225_p4), %s747_s12, 1 }
  0x13   : > { %p617_p12 = scmp.ne.s32.totalorder (!%p225_p4), %s747_s12, 0 }
  0x15   : > { %s285_s27 = scalar_select %p284_p7, %s759_s15, 1 }
  0x16   : > { %s964_s26 = smov (!%p286_p9, %s283_s26), 3  ;;  %s966_s15 = smov (!%p294_p8, %s759_s15), 3 }
  0x17   : > { %s606_s28 = sshll.u32 %s285_s27, 2  ;;  %s609_s4 = sshll.u32 %s966_s15, 2 }
  0x18   : > { %s289_s29 = sadd.s32 %s606_s28, %s964_s26  ;;  %s968_s14 = smov (!%p296_p10, %s755_s14), 1 }
  0x19   : > { %s607_s30 = sshll.u32 %s289_s29, 2  ;;  %s608_s13 = sshll.u32 %s968_s14, 1 }
  0x1a   : > { %s291_s7 = scalar_lea.vmem %s933_s0, %s607_s30  ;;  %s881_s10 = scalar_lea.vmem %s936_s3, %s607_s30 }
  0x1b   : > { %s299_s11 = scalar_select %p298_p11, %s747_s12, 1 }
  0x1c   : > { %334 = sbr.rel (%p617_p12) target bundleno = 37 (0x25), region = 36 }
  0x1d   : > { %s301_s25 = sadd.s32 %s608_s13, %s299_s11 }
  0x1e   : > { %s303_s27 = sadd.s32 %s609_s4, %s301_s25 }
  0x1f   : > { %s610_s24 = sshll.u32 %s303_s27, 2 }
  0x20   : > { %s305_s28 = scalar_lea.vmem %s934_s1, %s610_s24  ;;  %s891_s5 = scalar_lea.vmem %s935_s2, %s610_s24 }
  0x21   : > { %vm335_vm0 = vcmask 7168   ;;  %vm338_vm1 = vcmask 64512   ;;  %v781_v0 = vmov -1e+30   ;;  %v782_v1 = vmov 0.0  }
  0x22   : > { %336 = vst.msk [vmem:[#allocation2] sm:$0xff] %vm335_vm0, %v781_v0 }
  0x23   : > { %337 = vst.msk [vmem:[#allocation3] sm:$0xff] %vm335_vm0, %v782_v1 }
  0x24   : > { %339 = vst.msk [vmem:[#allocation4] sm:$0xff] %vm338_vm1, %v782_v1 }
  0x25 PF: > { %v341_v2 = vld [vmem:[%s305_s28] sm:$0xf]  ;;  %vm343_vm2 = vcmask 64512   ;;  %v364_v5 = vlaneseq  ;;  %s619_s14 = sshll.u32 %s747_s12, 3  ;;  %v783_v13 = vmov 0   ;;  %vm394_vm4 = vcmask 7168  }
  0x26   : > { %v348_v3 = vsel %vm343_vm2, %v341_v2, 0  ;;  %v340_v4 = vld [vmem:[%s291_s7] sm:$0xf]  ;;  %v366_v7 = vstv %s619_s14  ;;  %700 = vset.pattern.permute.xlu0 %v783_v13  ;;  %701 = vset.pattern.permute.xlu1 %v783_v13  ;;  %vm407_vm5 = vcmask 1043456   ;;  %p621_p13 = scmp.ne.s32.totalorder %s747_s12, 1 }
  0x27   : > { %357 = vmatpush.bf16.xpose.msra.mxu0 %v348_v3  ;;  %v365_v6 = vand.u32 127, %v364_v5  ;;  %v342_v20 = vld [vmem:[%s891_s5] sm:$0xf] }
  0x28   : > { %v409_v21 = vsel %vm407_vm5, %v342_v20, 0 }
  0x29   : > { %v367_v8 = vadd.s32 %v366_v7, %v365_v6  ;;  %v372_v14 = vld [vmem:[#allocation2] sm:$0xff]  ;;  %418 = vmatpush.bf16.msra.mxu1 %v409_v21 }
  0x2a   : > { %v388_v29 = vld [vmem:[#allocation3] sm:$0xff] }
  0x2b   : > { %vm368_vm3 = vcmp.lt.s32.totalorder %v367_v8, 13  ;;  %v396_v33 = vld [vmem:[#allocation4] sm:$0xff] }
  0x2e   : > { %618 = vmatmul.msk.bf16.vlgmr.msra.gmra.mxu0 %vm343_vm2, %v340_v4 }
  0xab   : > { %v359_v9 = vpop.f32.mrf.mxu0 }
  0xac   : > { %v371_v10 = vsel %vm368_vm3, %v359_v9, -1e+30 }
  0xad   : > { %v373_v11 = vsel %vm343_vm2, %v371_v10, -inf }
  0xae   : > { %374 = vmax.xlane.f32.xlu0 %v373_v11 }
  0xb3   : > { %v361_v12 = vpop.f32.mrf.mxu0 }
 0x121   : > { %v375_v15 = vpop.xlane.xlu0 %374 }
 0x122   : > { %v376_v16 = vmax.f32 %v372_v14, %v375_v15 }
 0x124   : > { %v377_v17 = vsub.f32 %v372_v14, %v376_v16  ;;  %426 = vst.msk [vmem:[#allocation2] sm:$0xff] %vm394_vm4, %v376_v16  ;;  %382 = vperm.xlu0 %700, %v376_v16  }
 0x126   : > { %v378_v18 = vmul.f32 1.442695, %v377_v17 }
 0x128   : > { %702 = vpow2.f32 %v378_v18 }
 0x12e   : > { %v703_v19 = vpop.eup %702 }
 0x12f   : > { %399 = vperm.xlu1 %701, %v703_v19   ;;  %v389_v30 = vmul.f32 %v703_v19, %v388_v29 }
 0x196   : > { %v383_v22 = vpop.permute.xlu0 %382 }
 0x197   : > { %v385_v23 = vsub.f32 %v371_v10, %v383_v22 }
 0x199   : > { %v386_v24 = vmul.f32 1.442695, %v385_v23 }
 0x19b   : > { %704 = vpow2.f32 %v386_v24 }
 0x1a1   : > { %v705_v25 = vpop.eup %704  ;;  %v400_v28 = vpop.permute.xlu1 %399 }
 0x1a2   : > { %v390_v26 = vsel %vm343_vm2, %v705_v25, 0.0  ;;  %v403_v27 = vpack.c.bf16 %v705_v25, %v705_v25  ;;  %v402_v34 = vmul.f32 %v400_v28, %v396_v33 }
 0x1a3   : > { %391 = vadd.xlane.f32.xlu1 %v390_v26 }
 0x1a4   : > { %620 = vmatmul.msk.bf16.vlgmr.msra.gmra.mxu1 %vm343_vm2, %v403_v27 }
 0x216   : > { %v392_v31 = vpop.xlane.xlu1 %391 }
 0x217   : > { %v393_v32 = vadd.f32 %v392_v31, %v389_v30 }
 0x219   : > { %395 = vst.msk [vmem:[#allocation3] sm:$0xff] %vm394_vm4, %v393_v32 }
 0x221   : > { %v420_v35 = vpop.f32.mrf.mxu1 }
 0x222   : > { %v424_v36 = vadd.f32 %v420_v35, %v402_v34 }
 0x224   : > { %425 = vst.msk [vmem:[#allocation4] sm:$0xff] %vm343_vm2, %v424_v36 }
 0x225   : > { %430 = sbr.rel (%p621_p13) target bundleno = 682 (0x2aa), region = 40 }
 0x229   : > { %v422_v37 = vpop.f32.mrf.mxu1 }
 0x22a   : > { %v431_v38 = vld [vmem:[#allocation3] sm:$0xff]  ;;  %v784_v39 = vmov 0   ;;  %vm441_vm6 = vcmask 60416  }
 0x22b   : > { %706 = vset.pattern.permute.xlu0 %v784_v39  ;;  %707 = vrcp.f32 %v431_v38  ;;  %v433_v41 = vld [vmem:[#allocation4] sm:$0xff] }
 0x231   : > { %v708_v40 = vpop.eup %707 }
 0x232   : > { %436 = vperm.xlu0 %706, %v708_v40  }
 0x2a4   : > { %v437_v42 = vpop.permute.xlu0 %436 }
 0x2a5   : > { %v439_v43 = vmul.f32 %v437_v42, %v433_v41 }
 0x2a7   : > { %v440_v44 = vpack.c.bf16 %v439_v43, %v439_v43 }
 0x2a9   : > { %442 = vst.msk [vmem:[%s881_s10] sm:$0xf] %vm441_vm6, %v440_v44 }
 0x2aa PF: > { %s13_s20 = sadd.s32 1, %s779_s20   ;;  %s939_s23 = sld [smem:[#allocation5_spill]] }
 0x2ab   : > { %p10_p0 = scmp.ge.s32.totalorder %s13_s20, 18   ;;  %s940_s24 = sld [smem:[#allocation6_spill]] }
 0x2ac   : > { %s941_s12 = smov %s763_s16  ;;  %s942_s13 = smov %s767_s17 }
 0x2ad   : > { %s943_s14 = smov %s771_s18  ;;  %s944_s15 = smov %s775_s19 }
 0x2ae   : > { %s945_s16 = smov %s950_s21  ;;  %s946_s17 = smov %s954_s22 }
 0x2af   :  { %12 = sbr.rel (!%p10_p0) target bundleno = 5 (0x5), region = 76 }
 0x2b0   : > { %s947_s18 = smov %s939_s23 }
 0x2b1   : > { %s948_s19 = smov %s940_s24 }

</bundles_post_ra>
